<compile_context>
chip_gen: v7x
topology: tpu7x:2x2x1
jax: 0.10.0
libtpu: 0.0.40
codegen_flags: <defaults>
</compile_context>

<pallas_src>
import functools

import jax
import jax.numpy as jnp
from jax import lax
from jax.experimental import pallas as pl
from jax.experimental.pallas import tpu as pltpu

_LANES = 128


def _round_up(x, m):
    return ((x + m - 1) // m) * m


def _cdiv(a, b):
    return -(-a // b)


def _acc_rows_for(tile_m):
    # Prefer several independent accumulator vregs (better VALU ILP / shorter
    # dependent-add chain); fall back to the whole tile for tiny/odd row counts.
    for r in (32, 16, 8):
        if tile_m % r == 0:
            return r
    return tile_m


def _focal_terms(p_raw, t_raw, gamma, binary_targets):
    """Per-element (1 - pt)^gamma * BCE (alpha applied by the caller)."""
    p = p_raw.astype(jnp.float32)
    t = t_raw.astype(jnp.float32)
    if binary_targets:
        # Opt-in fast path, exact only for hard 0/1 targets:
        # pt = p^t (1-p)^(1-t) collapses to a select -> 1 transcendental/elem.
        pt = jnp.where(t > 0.5, p, 1.0 - p)
        bce = -jnp.maximum(jnp.log(pt), -100.0)   # PyTorch BCE log clamp
    else:
        # F.binary_cross_entropy clamps each log term at -100 (PyTorch semantics).
        log_p = jnp.maximum(jnp.log(p), -100.0)
        log_1mp = jnp.maximum(jnp.log(1.0 - p), -100.0)
        bce = -(t * log_p + (1.0 - t) * log_1mp)
        pt = jnp.exp(-bce)
    omp = 1.0 - pt
    if gamma == 2:
        w = omp * omp          # explicit square: avoids pow -> exp/log on EUP
    elif gamma == 1:
        w = omp
    elif gamma == 0:
        w = jnp.ones_like(omp)
    else:
        w = omp ** gamma
    return w * bce


def _focal_sum_kernel(x_ref, t_ref, out_ref, acc_ref, *, gamma, binary_targets,
                      acc_rows, tile_m, grid_m, size, needs_mask):
    p = pl.program_id(0)
    i = pl.program_id(1)

    @pl.when(i == 0)
    def _init():
        acc_ref[...] = jnp.zeros_like(acc_ref)

    f = _focal_terms(x_ref[...], t_ref[...], gamma, binary_targets)

    if needs_mask:
        # Global flat element index of every slot in this tile, computed from the
        # UNCLAMPED block index so overhang/duplicate blocks and the ragged tail
        # (including undefined partial-block data) contribute exactly zero.
        row0 = (p * grid_m + i) * tile_m
        row_ids = row0 + lax.broadcasted_iota(jnp.int32, (tile_m, _LANES), 0)
        lane_ids = lax.broadcasted_iota(jnp.int32, (tile_m, _LANES), 1)
        f = jnp.where(row_ids * _LANES + lane_ids < size, f, 0.0)

    # Strided slab sum into acc_rows independent accumulator rows: elementwise
    # adds only (no per-step XLU reduce), with up to 4 vregs of ILP.
    acc_ref[...] += f.reshape(-1, acc_rows, _LANES).sum(axis=0)

    @pl.when(i == pl.num_programs(1) - 1)
    def _finalize():
        out_ref[...] = acc_ref[...]


def _focal_elem_kernel(x_ref, t_ref, o_ref, *, alpha, gamma, binary_targets):
    f = _focal_terms(x_ref[...], t_ref[...], gamma, binary_targets)
    o_ref[...] = (alpha * f).astype(o_ref.dtype)


def focal_loss(inputs, targets, alpha=0.75, gamma=2, reduce=True,
               tile_m_max=4096, assume_binary_targets=False):
    """Pallas implementation of FocalLoss.forward."""
    assert inputs.shape == targets.shape
    orig_shape = inputs.shape
    size = int(inputs.size)

    # Keep tile_m a multiple of 32 rows: covers the packed sublane tiling of
    # f32 (8), bf16 (16) and int8/fp8 (32) inputs.
    tile_m_max = max(_round_up(int(tile_m_max), 32), 32)

    rows = _cdiv(size, _LANES)
    pad = rows * _LANES - size

    flat_x = inputs.reshape(-1)
    flat_t = targets.reshape(-1)
    if pad:
        # Only the sub-128 remainder of the last row (p=t=1 -> zero focal term);
        # no round-up to tile multiples. The tail is masked in-kernel anyway.
        flat_x = jnp.pad(flat_x, (0, pad), constant_values=1)
        flat_t = jnp.pad(flat_t, (0, pad), constant_values=1)
    x2d = flat_x.reshape(rows, _LANES)
    t2d = flat_t.reshape(rows, _LANES)

    tile_m = rows if rows <= tile_m_max else tile_m_max
    total_tiles = _cdiv(rows, tile_m)

    x_bytes = tile_m * _LANES * jnp.dtype(inputs.dtype).itemsize
    t_bytes = tile_m * _LANES * jnp.dtype(targets.dtype).itemsize

    if reduce:
        # Leading "parallel" axis so each TensorCore (v7x) owns its own partial-sum
        # block; harmless on single-core parts.
        n_outer = 2 if total_tiles >= 2 else 1
        grid_m = _cdiv(total_tiles, n_outer)
        overhang = n_outer * grid_m - total_tiles
        acc_rows = _acc_rows_for(tile_m)
        needs_mask = (pad != 0) or (rows != total_tiles * tile_m) or (overhang != 0)

        if overhang:
            def in_map(p, i):
                return (jnp.minimum(p * grid_m + i, total_tiles - 1), 0)
        else:
            def in_map(p, i):
                return (p * grid_m + i, 0)

        kernel = functools.partial(
            _focal_sum_kernel, gamma=gamma, binary_targets=assume_binary_targets,
            acc_rows=acc_rows, tile_m=tile_m, grid_m=grid_m, size=size,
            needs_mask=needs_mask)

        need = 2 * (x_bytes + t_bytes) + 8 * acc_rows * _LANES * 4
        vmem_limit = int(min(max(2 * need, 16 << 20), 56 << 20))

        partial_sums = pl.pallas_call(
            kernel,
            out_shape=jax.ShapeDtypeStruct((n_outer * acc_rows, _LANES), jnp.float32),
            grid_spec=pltpu.PrefetchScalarGridSpec(
                num_scalar_prefetch=0,
                grid=(n_outer, grid_m),
                in_specs=[pl.BlockSpec((tile_m, _LANES), in_map),
                          pl.BlockSpec((tile_m, _LANES), in_map)],
                out_specs=pl.BlockSpec((acc_rows, _LANES), lambda p, i: (p, 0)),
                scratch_shapes=[pltpu.VMEM((acc_rows, _LANES), jnp.float32)],
            ),
            compiler_params=pltpu.CompilerParams(
                dimension_semantics=("parallel", "arbitrary"),
                vmem_limit_bytes=vmem_limit,
            ),
        )(x2d, t2d)
        # Single final cross-lane/sublane reduction; alpha and mean folded here.
        return (alpha * jnp.sum(partial_sums) / size).astype(jnp.float32)

    # reduce=False: elementwise focal loss, output in the input dtype.
    out_dtype = inputs.dtype
    o_bytes = tile_m * _LANES * jnp.dtype(out_dtype).itemsize
    need = 2 * (x_bytes + t_bytes + o_bytes)
    vmem_limit = int(min(max(2 * need, 16 << 20), 56 << 20))

    kernel = functools.partial(
        _focal_elem_kernel, alpha=float(alpha), gamma=gamma,
        binary_targets=assume_binary_targets)

    out2d = pl.pallas_call(
        kernel,
        out_shape=jax.ShapeDtypeStruct((rows, _LANES), out_dtype),
        grid_spec=pltpu.PrefetchScalarGridSpec(
            num_scalar_prefetch=0,
            grid=(total_tiles,),
            in_specs=[pl.BlockSpec((tile_m, _LANES), lambda i: (i, 0)),
                      pl.BlockSpec((tile_m, _LANES), lambda i: (i, 0))],
            out_specs=pl.BlockSpec((tile_m, _LANES), lambda i: (i, 0)),
        ),
        compiler_params=pltpu.CompilerParams(
            dimension_semantics=("parallel",),
            vmem_limit_bytes=vmem_limit,
        ),
    )(x2d, t2d)

    flat = out2d.reshape(-1)
    if pad:
        flat = flat[:size]
    return flat.reshape(orig_shape)


# ----------------------------- pure-JAX references -----------------------------
def _focal_loss_elem_ref(inputs, targets, alpha=0.75, gamma=2):
    p = inputs.astype(jnp.float32)
    t = targets.astype(jnp.float32)
    log_p = jnp.maximum(jnp.log(p), -100.0)
    log_1mp = jnp.maximum(jnp.log(1.0 - p), -100.0)
    bce = -(t * log_p + (1.0 - t) * log_1mp)
    pt = jnp.exp(-bce)
    return alpha * (1.0 - pt) ** gamma * bce


def _focal_loss_ref(inputs, targets, alpha=0.75, gamma=2):
    return jnp.mean(_focal_loss_elem_ref(inputs, targets, alpha, gamma))


if __name__ == "__main__":
    key = jax.random.PRNGKey(0)
    k1, k2, k3, k4, k5, k6 = jax.random.split(key, 6)

    # 1) Small, 128-aligned shape (no padding, single block).
    batch, feat = 16, 128
    logits = jax.random.normal(k1, (batch, feat), dtype=jnp.float32)
    inputs = jax.nn.sigmoid(logits)                       # probabilities in (0,1)
    targets = (jax.random.uniform(k2, (batch, feat)) > 0.5).astype(jnp.float32)

    out = jax.block_until_ready(focal_loss(inputs, targets))
    ref = _focal_loss_ref(inputs, targets)
    assert jnp.allclose(out, ref, rtol=1e-5, atol=1e-6), (out, ref)

    # Opt-in binary-target fast path (targets here are hard 0/1).
    out_fast = jax.block_until_ready(
        focal_loss(inputs, targets, assume_binary_targets=True))
    assert jnp.allclose(out_fast, ref, rtol=1e-5, atol=1e-6), (out_fast, ref)

    # 2) Ragged shape: exercises the <128-elem tail pad + in-kernel masking,
    #    reduce=True and reduce=False (input-dtype output) paths.
    b2, f2 = 7, 33
    logits2 = jax.random.normal(k3, (b2, f2), dtype=jnp.float32)
    inputs2 = jax.nn.sigmoid(logits2)
    targets2 = (jax.random.uniform(k4, (b2, f2)) > 0.5).astype(jnp.float32)

    out2 = jax.block_until_ready(focal_loss(inputs2, targets2))
    ref2 = _focal_loss_ref(inputs2, targets2)
    assert jnp.allclose(out2, ref2, rtol=1e-5, atol=1e-6), (out2, ref2)

    out3 = jax.block_until_ready(focal_loss(inputs2, targets2, reduce=False))
    ref3 = _focal_loss_elem_ref(inputs2, targets2)
    assert out3.dtype == inputs2.dtype
    assert jnp.allclose(out3.astype(jnp.float32), ref3, rtol=1e-5, atol=1e-6)

    # 3) Multi-tile path at a small size (tile_m_max=32): odd tile count forces the
    #    clamped overhang step on the parallel axis + partial last block masking.
    b3, f3 = 80, 128
    logits3 = jax.random.normal(k5, (b3, f3), dtype=jnp.float32)
    inputs3 = jax.nn.sigmoid(logits3)
    targets3 = (jax.random.uniform(k6, (b3, f3)) > 0.5).astype(jnp.float32)

    out4 = jax.block_until_ready(focal_loss(inputs3, targets3, tile_m_max=32))
    ref4 = _focal_loss_ref(inputs3, targets3)
    assert jnp.allclose(out4, ref4, rtol=1e-4, atol=1e-6), (out4, ref4)

    out5 = jax.block_until_ready(
        focal_loss(inputs3, targets3, reduce=False, tile_m_max=32))
    ref5 = _focal_loss_elem_ref(inputs3, targets3)
    assert jnp.allclose(out5, ref5, rtol=1e-5, atol=1e-6)

    print("KERNEL_OK")
</pallas_src>

<mosaic_0001>
module attributes {stable_mosaic.version = 11 : i64} {
  func.func @_focal_sum_kernel(%arg0: i32, %arg1: i32, %arg2: memref<16x128xf32, #tpu.memory_space<vmem>>, %arg3: memref<16x128xf32, #tpu.memory_space<vmem>>, %arg4: memref<16x128xf32, #tpu.memory_space<vmem>>, %arg5: memref<16x128xf32, #tpu.memory_space<vmem>>) attributes {dimension_semantics = [#tpu.dimension_semantics<parallel>, #tpu.dimension_semantics<arbitrary>], iteration_bounds = array<i64: 1, 1>, scalar_prefetch = 0 : i64, scratch_operands = 1 : i64, tpu.core_type = #tpu.core_type<tc>, window_params = [{transform_indices = @transform_0, window_bounds = array<i64: 16, 128>}, {transform_indices = @transform_1, window_bounds = array<i64: 16, 128>}, {transform_indices = @transform_2, window_bounds = array<i64: 16, 128>}]} {
    %c0_i32 = arith.constant 0 : i32
    %0 = arith.cmpi eq, %arg1, %c0_i32 : i32
    %1 = arith.extui %0 : i1 to i32
    %c0_i32_0 = arith.constant 0 : i32
    %2 = arith.cmpi ne, %1, %c0_i32_0 : i32
    scf.if %2 {
      %cst_17 = arith.constant 0.000000e+00 : f32
      %35 = vector.broadcast %cst_17 : f32 to vector<16x128xf32>
      %c0_18 = arith.constant 0 : index
      %c0_19 = arith.constant 0 : index
      %36 = vector.load %arg5[%c0_18, %c0_19] : memref<16x128xf32, #tpu.memory_space<vmem>>, vector<16x128xf32>
      tpu.vector_store %arg5[%c0_18, %c0_19], %35 {strides = array<i32>} : memref<16x128xf32, #tpu.memory_space<vmem>>, vector<16x128xf32>,
    } else {
    }
    %c0 = arith.constant 0 : index
    %c0_1 = arith.constant 0 : index
    %3 = vector.load %arg2[%c0, %c0_1] : memref<16x128xf32, #tpu.memory_space<vmem>>, vector<16x128xf32>
    %c0_2 = arith.constant 0 : index
    %c0_3 = arith.constant 0 : index
    %4 = vector.load %arg3[%c0_2, %c0_3] : memref<16x128xf32, #tpu.memory_space<vmem>>, vector<16x128xf32>
    %5 = math.log %3 : vector<16x128xf32>
    %cst = arith.constant -1.000000e+02 : f32
    %6 = vector.broadcast %cst : f32 to vector<16x128xf32>
    %7 = arith.maximumf %5, %6 : vector<16x128xf32>
    %cst_4 = arith.constant 1.000000e+00 : f32
    %8 = vector.broadcast %cst_4 : f32 to vector<16x128xf32>
    %9 = arith.subf %8, %3 : vector<16x128xf32>
    %10 = math.log %9 : vector<16x128xf32>
    %cst_5 = arith.constant -1.000000e+02 : f32
    %11 = vector.broadcast %cst_5 : f32 to vector<16x128xf32>
    %12 = arith.maximumf %10, %11 : vector<16x128xf32>
    %13 = arith.mulf %4, %7 : vector<16x128xf32>
    %cst_6 = arith.constant 1.000000e+00 : f32
    %14 = vector.broadcast %cst_6 : f32 to vector<16x128xf32>
    %15 = arith.subf %14, %4 : vector<16x128xf32>
    %16 = arith.mulf %15, %12 : vector<16x128xf32>
    %17 = arith.addf %13, %16 : vector<16x128xf32>
    %cst_7 = arith.constant 0.000000e+00 : f32
    %18 = vector.broadcast %cst_7 : f32 to vector<16x128xf32>
    %19 = arith.subf %18, %17 : vector<16x128xf32>
    %cst_8 = arith.constant 0.000000e+00 : f32
    %20 = vector.broadcast %cst_8 : f32 to vector<16x128xf32>
    %21 = arith.subf %20, %19 : vector<16x128xf32>
    %22 = math.exp %21 : vector<16x128xf32>
    %cst_9 = arith.constant 1.000000e+00 : f32
    %23 = vector.broadcast %cst_9 : f32 to vector<16x128xf32>
    %24 = arith.subf %23, %22 : vector<16x128xf32>
    %25 = arith.mulf %24, %24 : vector<16x128xf32>
    %26 = arith.mulf %25, %19 : vector<16x128xf32>
    %c0_10 = arith.constant 0 : index
    %c0_11 = arith.constant 0 : index
    %27 = vector.load %arg5[%c0_10, %c0_11] : memref<16x128xf32, #tpu.memory_space<vmem>>, vector<16x128xf32>
    %28 = vector.shape_cast %26 : vector<16x128xf32> to vector<1x16x128xf32>
    %cst_12 = arith.constant dense<0.000000e+00> : vector<16x128xf32>
    %29 = vector.multi_reduction <add>, %28, %cst_12 [0] : vector<1x16x128xf32> to vector<16x128xf32>
    %30 = arith.addf %27, %29 : vector<16x128xf32>
    %c0_13 = arith.constant 0 : index
    %c0_14 = arith.constant 0 : index
    %31 = vector.load %arg5[%c0_13, %c0_14] : memref<16x128xf32, #tpu.memory_space<vmem>>, vector<16x128xf32>
    tpu.vector_store %arg5[%c0_13, %c0_14], %30 {strides = array<i32>} : memref<16x128xf32, #tpu.memory_space<vmem>>, vector<16x128xf32>,
    %c0_i32_15 = arith.constant 0 : i32
    %32 = arith.cmpi eq, %arg1, %c0_i32_15 : i32
    %33 = arith.extui %32 : i1 to i32
    %c0_i32_16 = arith.constant 0 : i32
    %34 = arith.cmpi ne, %33, %c0_i32_16 : i32
    scf.if %34 {
      %c0_17 = arith.constant 0 : index
      %c0_18 = arith.constant 0 : index
      %35 = vector.load %arg5[%c0_17, %c0_18] : memref<16x128xf32, #tpu.memory_space<vmem>>, vector<16x128xf32>
      %c0_19 = arith.constant 0 : index
      %c0_20 = arith.constant 0 : index
      %36 = vector.load %arg4[%c0_19, %c0_20] : memref<16x128xf32, #tpu.memory_space<vmem>>, vector<16x128xf32>
      tpu.vector_store %arg4[%c0_19, %c0_20], %35 {strides = array<i32>} : memref<16x128xf32, #tpu.memory_space<vmem>>, vector<16x128xf32>,
    } else {
    }
    return
  }
  func.func @transform_0(%arg0: i32, %arg1: i32) -> (i32, i32) {
    %c1_i32 = arith.constant 1 : i32
    %0 = arith.muli %arg0, %c1_i32 : i32
    %1 = arith.addi %0, %arg1 : i32
    %c0_i32 = arith.constant 0 : i32
    %c0_i32_0 = arith.constant 0 : i32
    return %1, %c0_i32 : i32, i32
  }
  func.func @transform_1(%arg0: i32, %arg1: i32) -> (i32, i32) {
    %c1_i32 = arith.constant 1 : i32
    %0 = arith.muli %arg0, %c1_i32 : i32
    %1 = arith.addi %0, %arg1 : i32
    %c0_i32 = arith.constant 0 : i32
    %c0_i32_0 = arith.constant 0 : i32
    return %1, %c0_i32 : i32, i32
  }
  func.func @transform_2(%arg0: i32, %arg1: i32) -> (i32, i32) {
    %c0_i32 = arith.constant 0 : i32
    %c0_i32_0 = arith.constant 0 : i32
    return %arg0, %c0_i32 : i32, i32
  }
}

</mosaic_0001>

<bundles_post_ra>
// kernel: tpu_custom_call.1
= control target key start
LH: loop header
LB: loop body
LE: loop exit
PB: predicated region body
PF: predicated region fallthrough
CT: control target
= control target key end

     0   :  { %7 = vsyncpa [#allocation4], 0  ;;  %s285_s0 = inlined_call_operand.hbm [shape: f32[16,128], index: 0, kind: input, shape index: {}]   ;;  %s286_s1 = inlined_call_operand.hbm [shape: f32[16,128], index: 1, kind: input, shape index: {}]   ;;  %s287_s2 = inlined_call_operand.hbm [shape: f32[16,128], index: 2, kind: output, shape index: {}]  }
   0x1   :  { %8 = vsyncpa [#allocation7], 0 }
   0x2   :  { %9 = vsyncpa [#allocation5], 0  ;;  %s220_s9 = smov [#allocation3]   ;;  %s148_s13 = scalar_lea.hbm %s285_s0, 256 }
   0x3   :  { %s19_s10 = sshll.u32 %s220_s9, 4  ;;  %p149_p0 = scmp.ne.s32.totalorder %s285_s0, %s148_s13  ;;  %s20_s10 = int_to_ptr.vmem [resolvable:$true] %s19_s10 }
   0x4   :  { %p152_p1 = scmp.lt.u32.totalorder %s148_s13, %s285_s0 }
   0x6   :  { %p154_p2 = pnand %p152_p1, %p149_p0 }
   0x8   :  { %157 = shalt.err (!%p154_p2)
}
   0x9   :  { %s158_s18 = scalar_lea.vmem %s20_s10, 256  ;;  %p163_p4 = scmp.lt.s32.totalorder %s20_s10, %s20_s10 }
   0xa   :  { %p159_p3 = scmp.ne.s32.totalorder %s20_s10, %s158_s18  ;;  %p164_p5 = scmp.lt.s32.totalorder %s158_s18, %s158_s18 }
   0xc   :  { %p165_p6 = por %p164_p5, %p163_p4 }
   0xe   :  { %p166_p7 = pnand %p165_p6, %p159_p3 }
  0x10   :  { %169 = shalt.err (!%p166_p7)
}
  0x11   :  { %s221_s19 = smov 128   ;;  %s222_s20 = smov 8  }
  0x12   :  { %25 = dma.hbm_to_vmem [thread:$0]  %s285_s0, 256, %s20_s10, [#allocation4], %s221_s19, %s221_s19, %s222_s20  }
  0x13   :  { %s223_s23 = smov [#allocation6]   ;;  %s170_s27 = scalar_lea.hbm %s286_s1, 256 }
  0x14   :  { %s35_s24 = sshll.u32 %s223_s23, 4  ;;  %p171_p8 = scmp.ne.s32.totalorder %s286_s1, %s170_s27  ;;  %s36_s24 = int_to_ptr.vmem [resolvable:$true] %s35_s24 }
  0x15   :  { %p174_p9 = scmp.lt.u32.totalorder %s170_s27, %s286_s1 }
  0x17   :  { %p176_p10 = pnand %p174_p9, %p171_p8 }
  0x19   :  { %179 = shalt.err (!%p176_p10)
}
  0x1a   :  { %s180_s4 = scalar_lea.vmem %s36_s24, 256  ;;  %p185_p12 = scmp.lt.s32.totalorder %s36_s24, %s36_s24 }
  0x1b   :  { %p181_p11 = scmp.ne.s32.totalorder %s36_s24, %s180_s4  ;;  %p186_p13 = scmp.lt.s32.totalorder %s180_s4, %s180_s4 }
  0x1d   :  { %p187_p0 = por %p186_p13, %p185_p12 }
  0x1f   :  { %p188_p1 = pnand %p187_p0, %p181_p11 }
  0x21   :  { %191 = shalt.err (!%p188_p1)
}
  0x22   :  { %41 = dma.hbm_to_vmem [thread:$0]  %s286_s1, 256, %s36_s24, [#allocation7], %s221_s19, %s221_s19, %s222_s20  }
  0x23   :  { %214 = dma.done.wait [#allocation4], 256  }
  0x24   :  { %215 = vsyncadd [#allocation4], 4294967040 }
  0x25   :  { %216 = dma.done.wait [#allocation7], 256  }
  0x26   :  { %217 = vsyncadd [#allocation7], 4294967040  ;;  %v58_v0 = vld [vmem:[#allocation3] sm:$0xff]  ;;  %v59_v1 = vld [vmem:[#allocation3 + $0x8] sm:$0xff]  ;;  %s224_s1 = smov [#allocation8]  }
  0x27   :  { %136 = vlog2.f32 %v58_v0  ;;  %v68_v2 = vsub.f32 1.0, %v58_v0  ;;  %v69_v3 = vsub.f32 1.0, %v59_v1  ;;  %v60_v5 = vld [vmem:[#allocation6] sm:$0xff]  ;;  %v61_v8 = vld [vmem:[#allocation6 + $0x8] sm:$0xff]  ;;  %s118_s6 = sshll.u32 %s224_s1, 4  ;;  %s119_s6 = int_to_ptr.vmem [resolvable:$true] %s118_s6 }
  0x28   :  { %138 = vlog2.f32 %v59_v1  ;;  %v78_v14 = vsub.f32 1.0, %v60_v5  ;;  %v79_v17 = vsub.f32 1.0, %v61_v8  ;;  %s192_s7 = scalar_lea.vmem %s119_s6, 256  ;;  %p197_p3 = scmp.lt.s32.totalorder %s119_s6, %s119_s6 }
  0x29   :  { %140 = vlog2.f32 %v68_v2  ;;  %p193_p2 = scmp.ne.s32.totalorder %s119_s6, %s192_s7  ;;  %p198_p4 = scmp.lt.s32.totalorder %s192_s7, %s192_s7 }
  0x2a   :  { %142 = vlog2.f32 %v69_v3 }
  0x2b   :  { %p199_p5 = por %p198_p4, %p197_p3 }
  0x2d   :  { %p200_p6 = pnand %p199_p5, %p193_p2 }
  0x31   :  { %v137_v4 = vpop.eup %136 }
  0x32   :  { %v139_v6 = vpop.eup %138  ;;  %v63_v7 = vmul.f32 0.6931472, %v137_v4 }
  0x33   :  { %v141_v9 = vpop.eup %140  ;;  %v65_v10 = vmul.f32 0.6931472, %v139_v6 }
  0x34   :  { %v143_v11 = vpop.eup %142  ;;  %v66_v12 = vmax.f32 %v63_v7, -100.0  ;;  %v71_v13 = vmul.f32 0.6931472, %v141_v9 }
  0x35   :  { %v67_v15 = vmax.f32 %v65_v10, -100.0  ;;  %v73_v16 = vmul.f32 0.6931472, %v143_v11 }
  0x36   :  { %v74_v18 = vmax.f32 %v71_v13, -100.0  ;;  %v76_v19 = vmul.f32 %v66_v12, %v60_v5 }
  0x37   :  { %v75_v20 = vmax.f32 %v73_v16, -100.0  ;;  %v77_v21 = vmul.f32 %v67_v15, %v61_v8 }
  0x38   :  { %v80_v22 = vmul.f32 %v78_v14, %v74_v18 }
  0x39   :  { %v81_v23 = vmul.f32 %v79_v17, %v75_v20 }
  0x3a   :  { %v82_v24 = vadd.f32 %v80_v22, %v76_v19 }
  0x3b   :  { %v83_v25 = vadd.f32 %v81_v23, %v77_v21 }
  0x3c   :  { %v84_v26 = vsub.f32 0.0, %v82_v24 }
  0x3d   :  { %v85_v27 = vsub.f32 0.0, %v83_v25 }
  0x3e   :  { %v86_v28 = vsub.f32 0.0, %v84_v26 }
  0x3f   :  { %v87_v29 = vsub.f32 0.0, %v85_v27 }
  0x40   :  { %v88_v30 = vmul.f32 1.442695, %v86_v28 }
  0x41   :  { %v90_v31 = vmul.f32 1.442695, %v87_v29 }
  0x42   :  { %144 = vpow2.f32 %v88_v30 }
  0x43   :  { %146 = vpow2.f32 %v90_v31 }
  0x4c   :  { %v145_v32 = vpop.eup %144 }
  0x4d   :  { %v147_v33 = vpop.eup %146  ;;  %v92_v34 = vsub.f32 1.0, %v145_v32 }
  0x4e   :  { %v93_v35 = vsub.f32 1.0, %v147_v33 }
  0x4f   :  { %v94_v36 = vmul.f32 %v92_v34, %v92_v34 }
  0x50   :  { %v95_v37 = vmul.f32 %v93_v35, %v93_v35 }
  0x51   :  { %v96_v38 = vmul.f32 %v94_v36, %v84_v26 }
  0x52   :  { %v97_v39 = vmul.f32 %v95_v37, %v85_v27 }
  0x53   :  { %111 = vst [vmem:[#allocation8] sm:$0xff] %v96_v38 }
  0x54   :  { %112 = vst [vmem:[#allocation8 + $0x8] sm:$0xff] %v97_v39 }
  0x55   :  { %203 = shalt.err (!%p200_p6)
}
  0x56   :  { %s204_s10 = scalar_lea.hbm %s287_s2, 256 }
  0x57   :  { %p205_p7 = scmp.ne.s32.totalorder %s287_s2, %s204_s10  ;;  %p208_p8 = scmp.lt.u32.totalorder %s204_s10, %s287_s2 }
  0x59   :  { %p210_p9 = pnand %p208_p8, %p205_p7 }
  0x5b   :  { %213 = shalt.err (!%p210_p9)
}
  0x5c   :  { %124 = dma.vmem_to_hbm [thread:$0]  %s119_s6, 256, %s287_s2, [#allocation5], %s221_s19, %s221_s19, %s222_s20  }
  0x5d   :  { %218 = dma.done.wait [#allocation5], 256  }
  0x5e   :  { %219 = vsyncadd [#allocation5], 4294967040 }
  0x5f   :  { %128 = vsyncpa [#allocation4], 1 }
  0x60   :  { %129 = vsyncpa [#allocation7], 1 }
  0x61   :  { %130 = vsyncpa [#allocation5], 1 }

</bundles_post_ra>
